<compile_context>
chip_gen: v5e
topology: v5e:2x2
jax: 0.10.0
libtpu: 0.0.40
codegen_flags: <defaults>
</compile_context>

<pallas_src>
import math

import jax
import jax.numpy as jnp
from jax.experimental import pallas as pl
from jax.experimental.pallas import tpu as pltpu

LATENT_DIM = 50
MODEL_DIM = 64
COND_CLASSES = 189          # TARGET == 'all'

NCLS_PAD = 192              # 189 classes padded up (sublane-friendly, < one vreg of lanes x 2)
OUT_PAD = 128               # 50 output cols padded to a full lane width -> lane-dense bf16 stores
TB_MAX = 4096               # max batch tile (rows)


def _cdiv(a, b):
    return (a + b - 1) // b


def _round_up(n, m):
    return ((n + m - 1) // m) * m


# ----------------------------- glue (plain JAX, tiny) ------------------------

def get_timestep_embedding(timesteps, embedding_dim, max_positions=10000):
    assert timesteps.ndim == 1
    timesteps = timesteps * max_positions
    half_dim = embedding_dim // 2
    emb = math.log(max_positions) / (half_dim - 1)
    emb = jnp.exp(jnp.arange(half_dim, dtype=jnp.float32) * -emb)
    emb = timesteps.astype(jnp.float32)[:, None] * emb[None, :]
    emb = jnp.concatenate([jnp.sin(emb), jnp.cos(emb)], axis=1)
    if embedding_dim % 2 == 1:
        emb = jnp.pad(emb, ((0, 0), (0, 1)))
    return emb  # (N, embedding_dim)


# ----------------------------- Pallas kernel ---------------------------------

def _score_mlp_kernel(x_ref, y_ref, w1x_ref, ctab_ref, w2_ref, b2_ref,
                      w3_ref, b3_ref, o_ref):
    """Per batch tile:
       h0  = x @ W1_x + onehot(y) @ ctab     (ctab already contains E@W1_y + t_emb@W1_t + b1)
       h1  = relu(h0 @ W2 + b2)
       out = h1 @ W3_pad + b3_pad            (stored bf16, OUT_PAD lanes)
    """
    tb = x_ref.shape[0]
    ncls = ctab_ref.shape[0]

    x = x_ref[...].astype(jnp.bfloat16)               # (TB, 50) cast in-kernel (VPU filler)
    yid = y_ref[...]                                   # (TB, 1) int32

    # one-hot class gather on the MXU (valid ids are < COND_CLASSES <= NCLS_PAD)
    classes = jax.lax.broadcasted_iota(jnp.int32, (tb, ncls), 1)
    onehot = (classes == yid).astype(jnp.bfloat16)

    h0 = jnp.dot(x, w1x_ref[...], preferred_element_type=jnp.float32)
    h0 = h0 + jnp.dot(onehot, ctab_ref[...], preferred_element_type=jnp.float32)

    h1 = jnp.dot(h0.astype(jnp.bfloat16), w2_ref[...],
                 preferred_element_type=jnp.float32) + b2_ref[...]
    h1 = jnp.maximum(h1, 0.0)

    out = jnp.dot(h1.astype(jnp.bfloat16), w3_ref[...],
                  preferred_element_type=jnp.float32) + b3_ref[...]
    o_ref[...] = out.astype(o_ref.dtype)               # bf16 lane-dense store


def _run_score_mlp(x, y2d, w1x, ctab, w2, b2, w3p, b3p, *, tb):
    b = x.shape[0]
    grid = (_cdiv(b, tb),)
    return pl.pallas_call(
        _score_mlp_kernel,
        out_shape=jax.ShapeDtypeStruct((b, OUT_PAD), jnp.bfloat16),
        grid=grid,
        in_specs=[
            pl.BlockSpec((tb, LATENT_DIM), lambda i: (i, 0)),        # x tile (pipelined, f32)
            pl.BlockSpec((tb, 1), lambda i: (i, 0)),                 # y ids tile
            pl.BlockSpec((LATENT_DIM, MODEL_DIM), lambda i: (0, 0)),  # W1_x (resident, bf16)
            pl.BlockSpec((NCLS_PAD, MODEL_DIM), lambda i: (0, 0)),    # fused class table (resident)
            pl.BlockSpec((MODEL_DIM, MODEL_DIM), lambda i: (0, 0)),   # W2 (resident)
            pl.BlockSpec((1, MODEL_DIM), lambda i: (0, 0)),           # b2
            pl.BlockSpec((MODEL_DIM, OUT_PAD), lambda i: (0, 0)),     # W3 (lane-padded)
            pl.BlockSpec((1, OUT_PAD), lambda i: (0, 0)),             # b3 (lane-padded)
        ],
        out_specs=pl.BlockSpec((tb, OUT_PAD), lambda i: (i, 0)),
        compiler_params=pltpu.CompilerParams(
            dimension_semantics=("parallel",),
            vmem_limit_bytes=48 * 1024 * 1024,
        ),
    )(x, y2d, w1x, ctab, w2, b2, w3p, b3p)


# ----------------------------- parameters ------------------------------------

def init_params(key):
    ks = jax.random.split(key, 7)

    def linear_w(kw, fan_in, fan_out):
        bound = 1.0 / math.sqrt(fan_in)
        return jax.random.uniform(kw, (fan_in, fan_out), jnp.float32, -bound, bound)

    return {
        # nn.Embedding(189, 64): N(0, 1)
        "cond_embedding": jax.random.normal(ks[0], (COND_CLASSES, MODEL_DIM), jnp.float32),
        # embed_code_and_t: Linear(50 + 2*64 = 178, 64)
        "w1": linear_w(ks[1], LATENT_DIM + 2 * MODEL_DIM, MODEL_DIM),
        "b1": jax.random.uniform(ks[2], (1, MODEL_DIM), jnp.float32,
                                 -1.0 / math.sqrt(178), 1.0 / math.sqrt(178)),
        # pred_score.fc1: Linear(64, 64)
        "w2": linear_w(ks[3], MODEL_DIM, MODEL_DIM),
        "b2": jax.random.uniform(ks[4], (1, MODEL_DIM), jnp.float32, -1.0 / 8.0, 1.0 / 8.0),
        # pred_score.fc2: Linear(64, 50)
        "w3": linear_w(ks[5], MODEL_DIM, LATENT_DIM),
        "b3": jax.random.uniform(ks[6], (1, LATENT_DIM), jnp.float32, -1.0 / 8.0, 1.0 / 8.0),
    }


# ----------------------------- forward ----------------------------------------

def score_network_forward(params, x, y, t):
    """x: (B, LATENT_DIM) f32, y: (B,) int class ids (< COND_CLASSES), t: scalar time."""
    B = x.shape[0]

    # --- constant-per-call precompute (tiny, weight-sized only) ---
    t_arr = jnp.asarray(t, jnp.float32).reshape(1)
    t_emb = get_timestep_embedding(t_arr, MODEL_DIM)            # (1, 64) f32

    w1 = params["w1"]                                           # (178, 64)
    w1x = w1[:LATENT_DIM]                                       # (50, 64)
    w1t = w1[LATENT_DIM:LATENT_DIM + MODEL_DIM]                 # (64, 64)
    w1y = w1[LATENT_DIM + MODEL_DIM:]                           # (64, 64)

    # timestep contribution (same for every row) + b1 folded into every class row.
    tcon = t_emb @ w1t + params["b1"]                           # (1, 64)
    ctab = params["cond_embedding"] @ w1y + tcon                # (189, 64)
    ctab = jnp.pad(ctab, ((0, NCLS_PAD - COND_CLASSES), (0, 0))).astype(jnp.bfloat16)

    w1xb = w1x.astype(jnp.bfloat16)                             # (50, 64)
    w2 = params["w2"].astype(jnp.bfloat16)
    w3p = jnp.zeros((MODEL_DIM, OUT_PAD), jnp.float32).at[:, :LATENT_DIM].set(
        params["w3"]).astype(jnp.bfloat16)
    b3p = jnp.zeros((1, OUT_PAD), jnp.float32).at[:, :LATENT_DIM].set(params["b3"])

    # --- batch tiling: no activation padding; >=2 grid steps so both v7x cores work ---
    tb = min(TB_MAX, max(8, _round_up(_cdiv(B, 2), 8)))
    y2d = y.astype(jnp.int32).reshape(B, 1)

    out = _run_score_mlp(x.astype(jnp.float32), y2d, w1xb, ctab, w2,
                         params["b2"], w3p, b3p, tb=tb)          # (B, OUT_PAD) bf16
    out = out[:, :LATENT_DIM].astype(jnp.float32)

    # torch does x.squeeze(0) before the final FeedForward; only matters for B == 1.
    if B == 1:
        out = out[0]
    return out


# pure-JAX f32 reference (mirrors the torch forward exactly)
def _reference_forward(params, x, y, t):
    B = x.shape[0]
    t_embed = jnp.tile(
        get_timestep_embedding(jnp.asarray(t, jnp.float32).reshape(1), MODEL_DIM), (B, 1))
    y_embed = params["cond_embedding"][y]
    h = jnp.concatenate([x, t_embed, y_embed], axis=-1)
    h = h @ params["w1"] + params["b1"]
    h = jnp.maximum(h @ params["w2"] + params["b2"], 0.0)
    out = h @ params["w3"] + params["b3"]
    if B == 1:
        out = out[0]
    return out


if __name__ == "__main__":
    key = jax.random.PRNGKey(0)
    kp, kx, ky, kx2, ky2 = jax.random.split(key, 5)

    params = init_params(kp)
    fwd = jax.jit(score_network_forward)

    # small case from the spec: batch=2
    B = 2
    x = jax.random.normal(kx, (B, LATENT_DIM), jnp.float32)
    y = jax.random.randint(ky, (B,), 0, COND_CLASSES, jnp.int32)
    t = 0.37

    out = jax.block_until_ready(fwd(params, x, y, t))
    assert out.shape == (B, LATENT_DIM), out.shape
    ref = jax.block_until_ready(_reference_forward(params, x, y, t))
    # bf16 matmul operands + bf16 output store vs f32 reference -> ~1e-2-level divergence.
    assert jnp.allclose(out, ref, atol=5e-2, rtol=5e-2), \
        float(jnp.max(jnp.abs(out - ref)))

    # ragged batch (exercises the masked boundary block: grid = cdiv(53, 32) = 2)
    B2 = 53
    x2 = jax.random.normal(kx2, (B2, LATENT_DIM), jnp.float32)
    y2 = jax.random.randint(ky2, (B2,), 0, COND_CLASSES, jnp.int32)
    out2 = jax.block_until_ready(fwd(params, x2, y2, 0.81))
    ref2 = jax.block_until_ready(_reference_forward(params, x2, y2, 0.81))
    assert out2.shape == (B2, LATENT_DIM), out2.shape
    assert jnp.allclose(out2, ref2, atol=5e-2, rtol=5e-2), \
        float(jnp.max(jnp.abs(out2 - ref2)))

    print("KERNEL_OK")
</pallas_src>

<mosaic_0001>
module attributes {stable_mosaic.version = 11 : i64} {
  func.func @_score_mlp_kernel(%arg0: i32, %arg1: memref<8x50xf32, #tpu.memory_space<vmem>>, %arg2: memref<8x1xi32, #tpu.memory_space<vmem>>, %arg3: memref<50x64xbf16, #tpu.memory_space<vmem>>, %arg4: memref<192x64xbf16, #tpu.memory_space<vmem>>, %arg5: memref<64x64xbf16, #tpu.memory_space<vmem>>, %arg6: memref<1x64xf32, #tpu.memory_space<vmem>>, %arg7: memref<64x128xbf16, #tpu.memory_space<vmem>>, %arg8: memref<1x128xf32, #tpu.memory_space<vmem>>, %arg9: memref<8x128xbf16, #tpu.memory_space<vmem>>) attributes {dimension_semantics = [#tpu.dimension_semantics<parallel>], iteration_bounds = array<i64: 1>, scalar_prefetch = 0 : i64, scratch_operands = 0 : i64, tpu.core_type = #tpu.core_type<tc>, window_params = [{transform_indices = @transform_0, window_bounds = array<i64: 8, 50>}, {transform_indices = @transform_1, window_bounds = array<i64: 8, 1>}, {pipeline_mode = #tpu.pipeline_mode<synchronous>, transform_indices = @transform_2, window_bounds = array<i64: 50, 64>}, {pipeline_mode = #tpu.pipeline_mode<synchronous>, transform_indices = @transform_3, window_bounds = array<i64: 192, 64>}, {pipeline_mode = #tpu.pipeline_mode<synchronous>, transform_indices = @transform_4, window_bounds = array<i64: 64, 64>}, {pipeline_mode = #tpu.pipeline_mode<synchronous>, transform_indices = @transform_5, window_bounds = array<i64: 1, 64>}, {pipeline_mode = #tpu.pipeline_mode<synchronous>, transform_indices = @transform_6, window_bounds = array<i64: 64, 128>}, {pipeline_mode = #tpu.pipeline_mode<synchronous>, transform_indices = @transform_7, window_bounds = array<i64: 1, 128>}, {transform_indices = @transform_8, window_bounds = array<i64: 8, 128>}]} {
    %c0 = arith.constant 0 : index
    %c0_0 = arith.constant 0 : index
    %0 = vector.load %arg1[%c0, %c0_0] : memref<8x50xf32, #tpu.memory_space<vmem>>, vector<8x50xf32>
    %1 = arith.truncf %0 : vector<8x50xf32> to vector<8x50xbf16>
    %c0_1 = arith.constant 0 : index
    %c0_2 = arith.constant 0 : index
    %2 = vector.load %arg2[%c0_1, %c0_2] : memref<8x1xi32, #tpu.memory_space<vmem>>, vector<8x1xi32>
    %3 = tpu.iota {dimensions = array<i32: 1>} : vector<8x192xi32>
    %4 = vector.broadcast %2 : vector<8x1xi32> to vector<8x192xi32>
    %5 = arith.cmpi eq, %3, %4 : vector<8x192xi32>
    %6 = arith.extui %5 : vector<8x192xi1> to vector<8x192xi32>
    %7 = arith.sitofp %6 : vector<8x192xi32> to vector<8x192xf32>
    %8 = arith.truncf %7 : vector<8x192xf32> to vector<8x192xbf16>
    %c0_3 = arith.constant 0 : index
    %c0_4 = arith.constant 0 : index
    %9 = vector.load %arg3[%c0_3, %c0_4] : memref<50x64xbf16, #tpu.memory_space<vmem>>, vector<50x64xbf16>
    %cst = arith.constant dense<0.000000e+00> : vector<8x64xf32>
    %10 = tpu.matmul %1, %9, %cst {dimension_numbers = #tpu.dot_dimension_numbers<[1], [0], [0], [1], [0, 0, 1, 1], [], []>} : vector<8x50xbf16>, vector<50x64xbf16>, vector<8x64xf32> -> vector<8x64xf32>
    %c0_5 = arith.constant 0 : index
    %c0_6 = arith.constant 0 : index
    %11 = vector.load %arg4[%c0_5, %c0_6] : memref<192x64xbf16, #tpu.memory_space<vmem>>, vector<192x64xbf16>
    %cst_7 = arith.constant dense<0.000000e+00> : vector<8x64xf32>
    %12 = tpu.matmul %8, %11, %cst_7 {dimension_numbers = #tpu.dot_dimension_numbers<[1], [0], [0], [1], [0, 0, 1, 1], [], []>} : vector<8x192xbf16>, vector<192x64xbf16>, vector<8x64xf32> -> vector<8x64xf32>
    %13 = arith.addf %10, %12 : vector<8x64xf32>
    %14 = arith.truncf %13 : vector<8x64xf32> to vector<8x64xbf16>
    %c0_8 = arith.constant 0 : index
    %c0_9 = arith.constant 0 : index
    %15 = vector.load %arg5[%c0_8, %c0_9] : memref<64x64xbf16, #tpu.memory_space<vmem>>, vector<64x64xbf16>
    %cst_10 = arith.constant dense<0.000000e+00> : vector<8x64xf32>
    %16 = tpu.matmul %14, %15, %cst_10 {dimension_numbers = #tpu.dot_dimension_numbers<[1], [0], [0], [1], [0, 0, 1, 1], [], []>} : vector<8x64xbf16>, vector<64x64xbf16>, vector<8x64xf32> -> vector<8x64xf32>
    %c0_11 = arith.constant 0 : index
    %c0_12 = arith.constant 0 : index
    %17 = vector.load %arg6[%c0_11, %c0_12] : memref<1x64xf32, #tpu.memory_space<vmem>>, vector<1x64xf32>
    %18 = vector.broadcast %17 : vector<1x64xf32> to vector<8x64xf32>
    %19 = arith.addf %16, %18 : vector<8x64xf32>
    %cst_13 = arith.constant 0.000000e+00 : f32
    %20 = vector.broadcast %cst_13 : f32 to vector<8x64xf32>
    %21 = arith.maximumf %19, %20 : vector<8x64xf32>
    %22 = arith.truncf %21 : vector<8x64xf32> to vector<8x64xbf16>
    %c0_14 = arith.constant 0 : index
    %c0_15 = arith.constant 0 : index
    %23 = vector.load %arg7[%c0_14, %c0_15] : memref<64x128xbf16, #tpu.memory_space<vmem>>, vector<64x128xbf16>
    %cst_16 = arith.constant dense<0.000000e+00> : vector<8x128xf32>
    %24 = tpu.matmul %22, %23, %cst_16 {dimension_numbers = #tpu.dot_dimension_numbers<[1], [0], [0], [1], [0, 0, 1, 1], [], []>} : vector<8x64xbf16>, vector<64x128xbf16>, vector<8x128xf32> -> vector<8x128xf32>
    %c0_17 = arith.constant 0 : index
    %c0_18 = arith.constant 0 : index
    %25 = vector.load %arg8[%c0_17, %c0_18] : memref<1x128xf32, #tpu.memory_space<vmem>>, vector<1x128xf32>
    %26 = vector.broadcast %25 : vector<1x128xf32> to vector<8x128xf32>
    %27 = arith.addf %24, %26 : vector<8x128xf32>
    %28 = arith.truncf %27 : vector<8x128xf32> to vector<8x128xbf16>
    %c0_19 = arith.constant 0 : index
    %c0_20 = arith.constant 0 : index
    %29 = vector.load %arg9[%c0_19, %c0_20] : memref<8x128xbf16, #tpu.memory_space<vmem>>, vector<8x128xbf16>
    tpu.vector_store %arg9[%c0_19, %c0_20], %28 {strides = array<i32>} : memref<8x128xbf16, #tpu.memory_space<vmem>>, vector<8x128xbf16>,
    return
  }
  func.func @transform_0(%arg0: i32) -> (i32, i32) {
    %c0_i32 = arith.constant 0 : i32
    %c0_i32_0 = arith.constant 0 : i32
    return %arg0, %c0_i32 : i32, i32
  }
  func.func @transform_1(%arg0: i32) -> (i32, i32) {
    %c0_i32 = arith.constant 0 : i32
    %c0_i32_0 = arith.constant 0 : i32
    return %arg0, %c0_i32 : i32, i32
  }
  func.func @transform_2(%arg0: i32) -> (i32, i32) {
    %c0_i32 = arith.constant 0 : i32
    %c0_i32_0 = arith.constant 0 : i32
    %c0_i32_1 = arith.constant 0 : i32
    return %c0_i32, %c0_i32_0 : i32, i32
  }
  func.func @transform_3(%arg0: i32) -> (i32, i32) {
    %c0_i32 = arith.constant 0 : i32
    %c0_i32_0 = arith.constant 0 : i32
    %c0_i32_1 = arith.constant 0 : i32
    return %c0_i32, %c0_i32_0 : i32, i32
  }
  func.func @transform_4(%arg0: i32) -> (i32, i32) {
    %c0_i32 = arith.constant 0 : i32
    %c0_i32_0 = arith.constant 0 : i32
    %c0_i32_1 = arith.constant 0 : i32
    return %c0_i32, %c0_i32_0 : i32, i32
  }
  func.func @transform_5(%arg0: i32) -> (i32, i32) {
    %c0_i32 = arith.constant 0 : i32
    %c0_i32_0 = arith.constant 0 : i32
    %c0_i32_1 = arith.constant 0 : i32
    return %c0_i32, %c0_i32_0 : i32, i32
  }
  func.func @transform_6(%arg0: i32) -> (i32, i32) {
    %c0_i32 = arith.constant 0 : i32
    %c0_i32_0 = arith.constant 0 : i32
    %c0_i32_1 = arith.constant 0 : i32
    return %c0_i32, %c0_i32_0 : i32, i32
  }
  func.func @transform_7(%arg0: i32) -> (i32, i32) {
    %c0_i32 = arith.constant 0 : i32
    %c0_i32_0 = arith.constant 0 : i32
    %c0_i32_1 = arith.constant 0 : i32
    return %c0_i32, %c0_i32_0 : i32, i32
  }
  func.func @transform_8(%arg0: i32) -> (i32, i32) {
    %c0_i32 = arith.constant 0 : i32
    %c0_i32_0 = arith.constant 0 : i32
    return %arg0, %c0_i32 : i32, i32
  }
}

</mosaic_0001>

<bundles_post_ra>
// kernel: score_network_forward.1
= control target key start
LH: loop header
LB: loop body
LE: loop exit
PB: predicated region body
PF: predicated region fallthrough
CT: control target
= control target key end

     0   :  { %v525_v2 = vmov 0   ;;  %vm205_vm0 = vcmask 1040384   ;;  %vm201_vm1 = vcmask 408576   ;;  %v33_v24 = vlaneseq  ;;  %s665_s0 = inlined_call_operand.vmem [shape: f32[2,50], index: 0, kind: input, shape index: {}]   ;;  %s666_s1 = inlined_call_operand.vmem [shape: s32[2,1], index: 1, kind: input, shape index: {}]   ;;  %s667_s2 = inlined_call_operand.vmem [shape: bf16[50,64], index: 2, kind: input, shape index: {}]   ;;  %s668_s3 = inlined_call_operand.vmem [shape: bf16[192,64], index: 3, kind: input, shape index: {}]   ;;  %s669_s4 = inlined_call_operand.vmem [shape: bf16[64,64], index: 4, kind: input, shape index: {}]   ;;  %s670_s5 = inlined_call_operand.vmem [shape: f32[1,64], index: 5, kind: input, shape index: {}]   ;;  %s671_s6 = inlined_call_operand.vmem [shape: bf16[64,128], index: 6, kind: input, shape index: {}]   ;;  %s672_s7 = inlined_call_operand.vmem [shape: f32[1,128], index: 7, kind: input, shape index: {}]   ;;  %s673_s8 = inlined_call_operand.vmem [shape: bf16[2,128], index: 8, kind: output, shape index: {}]  }
   0x1   :  { %v32_v0 = vld [vmem:[%s666_s1] sm:$0xff]  ;;  %v506_v1 = vld [vmem:[%s668_s3 + $0x38] sm:$0xff]  ;;  %522 = vset.pattern.permute.xlu0 %v525_v2  ;;  %v505_v4 = vld [vmem:[%s668_s3 + $0x30] sm:$0xff]  ;;  %v526_v28 = vmov 0.0   ;;  %vm150_vm5 = vcmask 523264  }
   0x2   :  { %v53_v3 = vld [vmem:[%s667_s2 + $0x18] sm:$0x1]  ;;  %37 = vperm.xlu0 %522, %v32_v0   ;;  %154 = vmatpush.bf16.msra.mxu0 %v506_v1  ;;  %v509_v8 = vld [vmem:[%s668_s3 + $0x50] sm:$0xff]  ;;  %v504_v10 = vld [vmem:[%s668_s3 + $0x28] sm:$0xff]  ;;  %v34_v25 = vand.u32 127, %v33_v24 }
   0x3   :  { %v193_v5 = vunpack.c.l.b16 %v53_v3  ;;  %v510_v6 = vld [vmem:[%s668_s3 + $0x58] sm:$0xff]  ;;  %v498_v11 = vld [vmem:[%s667_s2 + $0x10] sm:$0xff]  ;;  %v508_v12 = vld [vmem:[%s668_s3 + $0x48] sm:$0xff]  ;;  %v527_v31 = vmov 1.0|1.0  }
   0x4   :  { %171 = vmatpush.bf16.msra.mxu1 %v510_v6  ;;  %v503_v13 = vld [vmem:[%s668_s3 + $0x20] sm:$0xff]  ;;  %v497_v14 = vld [vmem:[%s667_s2 + $0x8] sm:$0xff]  ;;  %v502_v15 = vld [vmem:[%s668_s3 + $0x18] sm:$0xff]  ;;  %v35_v26 = vadd.s32 128, %v34_v25 }
   0x5   :  { %v197_v7 = vpack.c.b16 %v193_v5, %v193_v5  ;;  %v496_v16 = vld [vmem:[%s667_s2] sm:$0xff]  ;;  %v501_v18 = vld [vmem:[%s668_s3 + $0x10] sm:$0xff]  ;;  %v500_v20 = vld [vmem:[%s668_s3 + $0x8] sm:$0xff] }
   0x6   :  { %155 = vmatpush.bf16.msra.mxu0 %v505_v4  ;;  %v30_v17 = vld [vmem:[%s665_s0] sm:$0xff]  ;;  %v514_v23 = vld [vmem:[%s669_s4 + $0x18] sm:$0xff]  ;;  %v513_v32 = vld [vmem:[%s669_s4 + $0x10] sm:$0xff] }
   0x7   :  { %v207_v9 = vsel %vm205_vm0, %v197_v7, 0  ;;  %v31_v19 = vpack.c.bf16 %v30_v17, %v30_v17  ;;  %v499_v21 = vld [vmem:[%s668_s3] sm:$0xff]  ;;  %266 = vmatpush.bf16.msra.mxu3 %v514_v23  ;;  %v512_v35 = vld [vmem:[%s669_s4 + $0x8] sm:$0xff]  ;;  %v518_v37 = vld [vmem:[%s671_s6 + $0x18] sm:$0xff] }
   0x8   :  { %213 = vmatpush.bf16.msra.mxu2 %v207_v9  ;;  %172 = vmatpush.bf16.msra.mxu1 %v509_v8  ;;  %v507_v22 = vld [vmem:[%s668_s3 + $0x40] sm:$0xff]  ;;  %v517_v38 = vld [vmem:[%s671_s6 + $0x10] sm:$0xff]  ;;  %v516_v39 = vld [vmem:[%s671_s6 + $0x8] sm:$0xff] }
   0x9   :  { %v511_v36 = vld [vmem:[%s669_s4] sm:$0xff] }
   0xa   :  { %156 = vmatpush.bf16.msra.mxu0 %v504_v10  ;;  %v515_v47 = vld [vmem:[%s671_s6] sm:$0xff] }
   0xb   :  { %267 = vmatpush.bf16.msra.mxu3 %v513_v32  ;;  %v523_v48 = vld [vmem:[%s670_s5] ss:$0 sm:$0xff] }
   0xc   :  { %214 = vmatpush.bf16.msra.mxu2 %v498_v11  ;;  %173 = vmatpush.bf16.msra.mxu1 %v508_v12  ;;  %v524_v54 = vld [vmem:[%s672_s7] ss:$0 sm:$0xff] }
   0xe   :  { %157 = vmatpush.bf16.msra.mxu0 %v503_v13 }
   0xf   :  { %268 = vmatpush.bf16.msra.mxu3 %v512_v35 }
  0x10   :  { %215 = vmatpush.bf16.msra.mxu2 %v497_v14  ;;  %174 = vmatpush.bf16.msra.mxu1 %v507_v22 }
  0x12   :  { %158 = vmatpush.bf16.msra.mxu0 %v502_v15 }
  0x13   :  { %269 = vmatpush.bf16.msra.mxu3 %v511_v36 }
  0x14   :  { %216 = vmatpush.bf16.msra.mxu2 %v496_v16  ;;  %320 = vmatpush.bf16.msrb.mxu1 %v518_v37 }
  0x16   :  { %159 = vmatpush.bf16.msra.mxu0 %v501_v18 }
  0x17   :  { %461 = vmatmul.msk.bf16.vlgmr.msra.gmra.mxu2 %vm201_vm1, %v31_v19 }
  0x18   :  { %321 = vmatpush.bf16.msrb.mxu1 %v517_v38 }
  0x1a   :  { %160 = vmatpush.bf16.msra.mxu0 %v500_v20 }
  0x1c   :  { %322 = vmatpush.bf16.msrb.mxu1 %v516_v39 }
  0x1e   :  { %161 = vmatpush.bf16.msra.mxu0 %v499_v21 }
  0x20   :  { %323 = vmatpush.bf16.msrb.mxu1 %v515_v47 }
  0x74   :  { %v38_v27 = vpop.permute.xlu0 %37 }
  0x75   :  { %vm39_vm2 = vcmp.eq.s32.totalorder %v34_v25, %v38_v27  ;;  %vm40_vm3 = vcmp.eq.s32.totalorder %v35_v26, %v38_v27 }
  0x76   :  { %v397_v29 = vsel %vm40_vm3, 1.0, %v526_v28  ;;  %vm446_vm4 = vmpackc.low %vm39_vm2, %vm39_vm2 }
  0x77   :  { %v46_v30 = vpack.c.bf16 %v397_v29, %v397_v29  ;;  %447 = vmatmul.msk.bf16.vlgmr.msra.gmra.mxu0 %vm446_vm4, %v527_v31 }
  0x79   :  { %448 = vmatmul.msk.bf16.vlgmr.msra.gmra.mxu1 %vm150_vm5, %v46_v30 }
  0x9a   :  { %v218_v33 = vpop.f32.mrf.mxu2 }
  0xa2   :  { %v220_v34 = vpop.f32.mrf.mxu2 }
  0xf4   :  { %v163_v40 = vpop.f32.mrf.mxu0 }
  0xf6   :  { %v176_v41 = vpop.f32.mrf.mxu1 }
  0xf7   :  { %v177_v42 = vadd.f32 %v176_v41, %v163_v40 }
  0xf9   :  { %v219_v43 = vadd.f32 %v218_v33, %v177_v42 }
  0xfb   :  { %v222_v44 = vpack.c.bf16 %v219_v43, %v219_v43 }
  0xfc   :  { %v165_v45 = vpop.f32.mrf.mxu0 }
  0xfd   :  { %478 = vmatmul.msk.bf16.vlgmr.msra.gmra.mxu3 %vm150_vm5, %v222_v44 }
  0xfe   :  { %v178_v46 = vpop.f32.mrf.mxu1 }
 0x180   :  { %v271_v49 = vpop.f32.mrf.mxu3 }
 0x181   :  { %v272_v50 = vadd.f32 %v523_v48, %v271_v49 }
 0x183   :  { %v275_v51 = vmax.f32 %v272_v50, 0.0 }
 0x185   :  { %v276_v52 = vpack.c.bf16 %v275_v51, %v275_v51 }
 0x187   :  { %495 = vmatmul.msk.bf16.vlgmr.msrb.gmra.mxu1 %vm150_vm5, %v276_v52 }
 0x188   :  { %v273_v53 = vpop.f32.mrf.mxu3 }
 0x204   :  { %v325_v55 = vpop.f32.mrf.mxu1 }
 0x205   :  { %v326_v56 = vadd.f32 %v524_v54, %v325_v55 }
 0x207   :  { %v329_v57 = vpack.c.bf16 %v326_v56, %v326_v56 }
 0x209   :  { %v331_v58 = vrot.slane %v329_v57, 3 }
 0x20b   :  { %v334_v59 = vsel %vm205_vm0, %v329_v57, %v331_v58 }
 0x20c   :  { %351 = vst [vmem:[#allocation2] sm:$0x1] %v334_v59  ;;  %v327_v60 = vpop.f32.mrf.mxu1 }
 0x213   :  { %v373_v61 = vld [vmem:[#allocation2] sm:$0x1] }
 0x214   :  { %374 = vst [vmem:[%s673_s8] sm:$0x1] %v373_v61 }

</bundles_post_ra>
